<compile_context>
chip_gen: v5e
topology: v5e:2x2
jax: 0.10.0
libtpu: 0.0.40
codegen_flags: <defaults>
</compile_context>

<pallas_src>
import jax
import jax.numpy as jnp
from jax.experimental import pallas as pl
from jax.experimental.pallas import tpu as pltpu


def _ffn_kernel(x_ref, w1_ref, w2_ref, b2_ref, o_ref):
    # x_ref:  (N, C_pad, HW)  channel-major, pixels on lane axis; last
    #                         channels are [ones (bias), zero padding]
    # w1_ref: (mlp_dim, C_pad) conv1 weight with b1 folded into column C_in
    # w2_ref: (C_out, mlp_dim)
    # b2_ref: (C_out, 1)
    # o_ref:  (N, C_out, HW)
    w1 = w1_ref[...]
    w2 = w2_ref[...]
    b2 = b2_ref[...]
    # Unrolled loop over the (tiny, static) batch inside ONE grid step.
    for n in range(x_ref.shape[0]):
        xn = x_ref[n]                                          # (C_pad, HW)
        # matmul1: bias already folded in via the ones channel.
        # NOTE: on v5e/v6e this K<=8 contraction could be done as unrolled
        # broadcast-FMAs on the VALU instead of the MXU; kept on MXU for
        # portability (v7x MRB makes the dot the right choice there).
        h = jnp.dot(w1, xn, preferred_element_type=jnp.float32)
        h = jnp.maximum(h, 0.0)                                # ReLU
        # TODO(synk): Dropout2d omitted (identity in eval / inference mode).
        y = jnp.dot(w2, h, preferred_element_type=jnp.float32) + b2
        o_ref[n] = y.astype(o_ref.dtype)


def position_wise_ffn1(x_nchw, w1, b1, w2, b2):
    """x_nchw: (N, C_in, H, W); w1: (mlp_dim, C_in); w2: (C_out, mlp_dim)."""
    N, C_in, H, W = x_nchw.shape
    mlp_dim = w1.shape[0]
    C_out = w2.shape[0]
    HW = H * W

    # Pad channels to a sublane multiple (>=8 for f32) and fold b1 into W1:
    # x gets [x; ones; zeros] channels, W1 gets [w1, b1, zeros] columns.
    C_pad = max(8, ((C_in + 1 + 7) // 8) * 8)
    x3 = x_nchw.reshape(N, C_in, HW)
    x_aug = jnp.concatenate(
        [x3,
         jnp.ones((N, 1, HW), x_nchw.dtype),
         jnp.zeros((N, C_pad - C_in - 1, HW), x_nchw.dtype)],
        axis=1)                                               # (N, C_pad, HW)
    w1_aug = jnp.zeros((mlp_dim, C_pad), w1.dtype)
    w1_aug = w1_aug.at[:, :C_in].set(w1)
    w1_aug = w1_aug.at[:, C_in].set(b1)
    b2_col = b2.reshape(C_out, 1)

    out = pl.pallas_call(
        _ffn_kernel,
        out_shape=jax.ShapeDtypeStruct((N, C_out, HW), x_nchw.dtype),
        grid_spec=pltpu.PrefetchScalarGridSpec(
            num_scalar_prefetch=0,
            grid=(1,),  # single step: whole op (~0.3 MiB) fits VMEM easily
            in_specs=[
                pl.BlockSpec((N, C_pad, HW), lambda i: (0, 0, 0)),
                pl.BlockSpec((mlp_dim, C_pad), lambda i: (0, 0)),
                pl.BlockSpec((C_out, mlp_dim), lambda i: (0, 0)),
                pl.BlockSpec((C_out, 1), lambda i: (0, 0)),
            ],
            out_specs=pl.BlockSpec((N, C_out, HW), lambda i: (0, 0, 0)),
        ),
        compiler_params=pltpu.CompilerParams(
            dimension_semantics=("arbitrary",)),
    )(x_aug, w1_aug, w2, b2_col)

    # (N, C_out, H*W) -> NCHW (pure reshape, no transpose).
    return out.reshape(N, C_out, H, W)


if __name__ == "__main__":
    # Module config: in_features=4, out_features=4, mlp_dim=128.
    N, C_in, H, W = 2, 4, 16, 16
    mlp_dim, C_out = 128, 4

    key = jax.random.PRNGKey(0)
    k_x, k_w1, k_b1, k_w2, k_b2 = jax.random.split(key, 5)

    x = jax.random.normal(k_x, (N, C_in, H, W), dtype=jnp.float32)
    # Conv2d 1x1 weights: (out_ch, in_ch, 1, 1) -> stored here as (out_ch, in_ch).
    w1 = jax.random.normal(k_w1, (mlp_dim, C_in), dtype=jnp.float32) * 0.1
    b1 = jax.random.normal(k_b1, (mlp_dim,), dtype=jnp.float32) * 0.1
    w2 = jax.random.normal(k_w2, (C_out, mlp_dim), dtype=jnp.float32) * 0.1
    b2 = jax.random.normal(k_b2, (C_out,), dtype=jnp.float32) * 0.1

    y = position_wise_ffn1(x, w1, b1, w2, b2)
    jax.block_until_ready(y)

    # Pure-JAX reference (1x1 conv == channel matmul).
    x_rows = jnp.transpose(x, (0, 2, 3, 1)).reshape(-1, C_in)
    h_ref = jnp.maximum(x_rows @ w1.T + b1, 0.0)
    y_ref = (h_ref @ w2.T + b2).reshape(N, H, W, C_out).transpose(0, 3, 1, 2)
    assert y.shape == (N, C_out, H, W)
    assert jnp.allclose(y, y_ref, atol=1e-5, rtol=1e-5)

    print("KERNEL_OK")
</pallas_src>

<mosaic_0001>
module attributes {stable_mosaic.version = 11 : i64} {
  func.func @_ffn_kernel(%arg0: i32, %arg1: memref<2x8x256xf32, #tpu.memory_space<vmem>>, %arg2: memref<128x8xf32, #tpu.memory_space<vmem>>, %arg3: memref<4x128xf32, #tpu.memory_space<vmem>>, %arg4: memref<4x1xf32, #tpu.memory_space<vmem>>, %arg5: memref<2x4x256xf32, #tpu.memory_space<vmem>>) attributes {dimension_semantics = [#tpu.dimension_semantics<arbitrary>], iteration_bounds = array<i64: 1>, scalar_prefetch = 0 : i64, scratch_operands = 0 : i64, tpu.core_type = #tpu.core_type<tc>, window_params = [{pipeline_mode = #tpu.pipeline_mode<synchronous>, transform_indices = @transform_0, window_bounds = array<i64: 2, 8, 256>}, {pipeline_mode = #tpu.pipeline_mode<synchronous>, transform_indices = @transform_1, window_bounds = array<i64: 128, 8>}, {pipeline_mode = #tpu.pipeline_mode<synchronous>, transform_indices = @transform_2, window_bounds = array<i64: 4, 128>}, {pipeline_mode = #tpu.pipeline_mode<synchronous>, transform_indices = @transform_3, window_bounds = array<i64: 4, 1>}, {pipeline_mode = #tpu.pipeline_mode<synchronous>, transform_indices = @transform_4, window_bounds = array<i64: 2, 4, 256>}]} {
    %c0 = arith.constant 0 : index
    %c0_0 = arith.constant 0 : index
    %0 = vector.load %arg2[%c0, %c0_0] : memref<128x8xf32, #tpu.memory_space<vmem>>, vector<128x8xf32>
    %c0_1 = arith.constant 0 : index
    %c0_2 = arith.constant 0 : index
    %1 = vector.load %arg3[%c0_1, %c0_2] : memref<4x128xf32, #tpu.memory_space<vmem>>, vector<4x128xf32>
    %c0_3 = arith.constant 0 : index
    %c0_4 = arith.constant 0 : index
    %2 = vector.load %arg4[%c0_3, %c0_4] : memref<4x1xf32, #tpu.memory_space<vmem>>, vector<4x1xf32>
    %c0_5 = arith.constant 0 : index
    %c0_6 = arith.constant 0 : index
    %c0_7 = arith.constant 0 : index
    %3 = vector.load %arg1[%c0_5, %c0_6, %c0_7] : memref<2x8x256xf32, #tpu.memory_space<vmem>>, vector<1x8x256xf32>
    %4 = vector.shape_cast %3 : vector<1x8x256xf32> to vector<8x256xf32>
    %cst = arith.constant dense<0.000000e+00> : vector<128x256xf32>
    %5 = tpu.matmul %0, %4, %cst {dimension_numbers = #tpu.dot_dimension_numbers<[1], [0], [0], [1], [0, 0, 1, 1], [], []>} : vector<128x8xf32>, vector<8x256xf32>, vector<128x256xf32> -> vector<128x256xf32>
    %cst_8 = arith.constant 0.000000e+00 : f32
    %6 = vector.broadcast %cst_8 : f32 to vector<128x256xf32>
    %7 = arith.maximumf %5, %6 : vector<128x256xf32>
    %cst_9 = arith.constant dense<0.000000e+00> : vector<4x256xf32>
    %8 = tpu.matmul %1, %7, %cst_9 {dimension_numbers = #tpu.dot_dimension_numbers<[1], [0], [0], [1], [0, 0, 1, 1], [], []>} : vector<4x128xf32>, vector<128x256xf32>, vector<4x256xf32> -> vector<4x256xf32>
    %9 = vector.broadcast %2 : vector<4x1xf32> to vector<4x256xf32>
    %10 = arith.addf %8, %9 : vector<4x256xf32>
    %c0_10 = arith.constant 0 : index
    %c0_11 = arith.constant 0 : index
    %c0_12 = arith.constant 0 : index
    %11 = vector.load %arg5[%c0_10, %c0_11, %c0_12] : memref<2x4x256xf32, #tpu.memory_space<vmem>>, vector<1x4x256xf32>
    %12 = vector.shape_cast %11 : vector<1x4x256xf32> to vector<4x256xf32>
    %13 = vector.shape_cast %10 : vector<4x256xf32> to vector<1x4x256xf32>
    tpu.vector_store %arg5[%c0_10, %c0_11, %c0_12], %13 {strides = array<i32>} : memref<2x4x256xf32, #tpu.memory_space<vmem>>, vector<1x4x256xf32>,
    %c1 = arith.constant 1 : index
    %c0_13 = arith.constant 0 : index
    %c0_14 = arith.constant 0 : index
    %14 = vector.load %arg1[%c1, %c0_13, %c0_14] : memref<2x8x256xf32, #tpu.memory_space<vmem>>, vector<1x8x256xf32>
    %15 = vector.shape_cast %14 : vector<1x8x256xf32> to vector<8x256xf32>
    %cst_15 = arith.constant dense<0.000000e+00> : vector<128x256xf32>
    %16 = tpu.matmul %0, %15, %cst_15 {dimension_numbers = #tpu.dot_dimension_numbers<[1], [0], [0], [1], [0, 0, 1, 1], [], []>} : vector<128x8xf32>, vector<8x256xf32>, vector<128x256xf32> -> vector<128x256xf32>
    %cst_16 = arith.constant 0.000000e+00 : f32
    %17 = vector.broadcast %cst_16 : f32 to vector<128x256xf32>
    %18 = arith.maximumf %16, %17 : vector<128x256xf32>
    %cst_17 = arith.constant dense<0.000000e+00> : vector<4x256xf32>
    %19 = tpu.matmul %1, %18, %cst_17 {dimension_numbers = #tpu.dot_dimension_numbers<[1], [0], [0], [1], [0, 0, 1, 1], [], []>} : vector<4x128xf32>, vector<128x256xf32>, vector<4x256xf32> -> vector<4x256xf32>
    %20 = vector.broadcast %2 : vector<4x1xf32> to vector<4x256xf32>
    %21 = arith.addf %19, %20 : vector<4x256xf32>
    %c1_18 = arith.constant 1 : index
    %c0_19 = arith.constant 0 : index
    %c0_20 = arith.constant 0 : index
    %22 = vector.load %arg5[%c1_18, %c0_19, %c0_20] : memref<2x4x256xf32, #tpu.memory_space<vmem>>, vector<1x4x256xf32>
    %23 = vector.shape_cast %22 : vector<1x4x256xf32> to vector<4x256xf32>
    %24 = vector.shape_cast %21 : vector<4x256xf32> to vector<1x4x256xf32>
    tpu.vector_store %arg5[%c1_18, %c0_19, %c0_20], %24 {strides = array<i32>} : memref<2x4x256xf32, #tpu.memory_space<vmem>>, vector<1x4x256xf32>,
    return
  }
  func.func @transform_0(%arg0: i32) -> (i32, i32, i32) {
    %c0_i32 = arith.constant 0 : i32
    %c0_i32_0 = arith.constant 0 : i32
    %c0_i32_1 = arith.constant 0 : i32
    %c0_i32_2 = arith.constant 0 : i32
    return %c0_i32, %c0_i32_0, %c0_i32_1 : i32, i32, i32
  }
  func.func @transform_1(%arg0: i32) -> (i32, i32) {
    %c0_i32 = arith.constant 0 : i32
    %c0_i32_0 = arith.constant 0 : i32
    %c0_i32_1 = arith.constant 0 : i32
    return %c0_i32, %c0_i32_0 : i32, i32
  }
  func.func @transform_2(%arg0: i32) -> (i32, i32) {
    %c0_i32 = arith.constant 0 : i32
    %c0_i32_0 = arith.constant 0 : i32
    %c0_i32_1 = arith.constant 0 : i32
    return %c0_i32, %c0_i32_0 : i32, i32
  }
  func.func @transform_3(%arg0: i32) -> (i32, i32) {
    %c0_i32 = arith.constant 0 : i32
    %c0_i32_0 = arith.constant 0 : i32
    %c0_i32_1 = arith.constant 0 : i32
    return %c0_i32, %c0_i32_0 : i32, i32
  }
  func.func @transform_4(%arg0: i32) -> (i32, i32, i32) {
    %c0_i32 = arith.constant 0 : i32
    %c0_i32_0 = arith.constant 0 : i32
    %c0_i32_1 = arith.constant 0 : i32
    %c0_i32_2 = arith.constant 0 : i32
    return %c0_i32, %c0_i32_0, %c0_i32_1 : i32, i32, i32
  }
}

</mosaic_0001>

<bundles_post_ra>
// kernel: tpu_custom_call.1
= control target key start
LH: loop header
LB: loop body
LE: loop exit
PB: predicated region body
PF: predicated region fallthrough
CT: control target
= control target key end

     0   :  { %vm38_vm0 = vcmask 64512   ;;  %s978_s0 = inlined_call_operand.vmem [shape: f32[2,8,256], index: 0, kind: input, shape index: {}]   ;;  %s979_s1 = inlined_call_operand.vmem [shape: f32[128,8], index: 1, kind: input, shape index: {}]   ;;  %s980_s2 = inlined_call_operand.vmem [shape: f32[4,128], index: 2, kind: input, shape index: {}]   ;;  %s981_s3 = inlined_call_operand.vmem [shape: f32[4,1], index: 3, kind: input, shape index: {}]   ;;  %s982_s4 = inlined_call_operand.hbm [shape: f32[2,4,256], index: 4, kind: output, shape index: {}]  }
   0x1   :  { %v36_v0 = vld [vmem:[%s978_s0] sm:$0xff]  ;;  %v37_v1 = vld [vmem:[%s978_s0 + $0x8] sm:$0xff] }
   0x2   :  { %v666_v2 = vld [vmem:[%s979_s1] sm:$0xff]  ;;  %102 = vmatpush.msra.mxu0 %v36_v0  ;;  %167 = vmatpush.msra.mxu1 %v37_v1 }
   0x3   :  { %531 = vmatmul.msk.f32.vlgmr.msra.gmra.mxu0 %vm38_vm0, %v666_v2  ;;  %547 = vmatmul.msk.f32.vlgmr.msra.gmra.mxu1 %vm38_vm0, %v666_v2 }
   0x4   :  { %9 = vsyncpa [#allocation3], 0  ;;  %v675_v3 = vld [vmem:[%s979_s1 + $0x8] sm:$0xff]  ;;  %v684_v4 = vld [vmem:[%s979_s1 + $0x10] sm:$0xff]  ;;  %v628_v62 = vmov 0   ;;  %vm297_vm1 = vcmask 1043456  }
   0x5   :  { %v693_v5 = vld [vmem:[%s979_s1 + $0x18] sm:$0xff]  ;;  %v702_v6 = vld [vmem:[%s979_s1 + $0x20] sm:$0xff]  ;;  %v711_v7 = vld [vmem:[%s979_s1 + $0x28] sm:$0xff]  ;;  %601 = vset.pattern.permute.xlu0 %v628_v62  ;;  %s519_s7 = sshll.u32 %s982_s4, 4  ;;  %s630_s8 = smov 128   ;;  %s520_s7 = int_to_ptr.hbm [resolvable:$true] %s519_s7 }
   0x6   :  { %v720_v8 = vld [vmem:[%s979_s1 + $0x30] sm:$0xff]  ;;  %v729_v9 = vld [vmem:[%s979_s1 + $0x38] sm:$0xff]  ;;  %v738_v10 = vld [vmem:[%s979_s1 + $0x40] sm:$0xff]  ;;  %s631_s9 = smov 8  }
   0x7   :  { %v747_v11 = vld [vmem:[%s979_s1 + $0x48] sm:$0xff]  ;;  %v756_v12 = vld [vmem:[%s979_s1 + $0x50] sm:$0xff]  ;;  %v765_v13 = vld [vmem:[%s979_s1 + $0x58] sm:$0xff] }
   0x8   :  { %v774_v14 = vld [vmem:[%s979_s1 + $0x60] sm:$0xff]  ;;  %v783_v15 = vld [vmem:[%s979_s1 + $0x68] sm:$0xff]  ;;  %v792_v16 = vld [vmem:[%s979_s1 + $0x70] sm:$0xff] }
   0x9   :  { %v801_v17 = vld [vmem:[%s979_s1 + $0x78] sm:$0xff] }
   0xb   :  { %532 = vmatmul.msk.f32.gmra.mxu0 %vm38_vm0, %v675_v3  ;;  %548 = vmatmul.msk.f32.gmra.mxu1 %vm38_vm0, %v675_v3 }
  0x13   :  { %533 = vmatmul.msk.f32.gmra.mxu0 %vm38_vm0, %v684_v4  ;;  %549 = vmatmul.msk.f32.gmra.mxu1 %vm38_vm0, %v684_v4 }
  0x1b   :  { %534 = vmatmul.msk.f32.gmra.mxu0 %vm38_vm0, %v693_v5  ;;  %550 = vmatmul.msk.f32.gmra.mxu1 %vm38_vm0, %v693_v5 }
  0x23   :  { %535 = vmatmul.msk.f32.gmra.mxu0 %vm38_vm0, %v702_v6  ;;  %551 = vmatmul.msk.f32.gmra.mxu1 %vm38_vm0, %v702_v6 }
  0x2b   :  { %536 = vmatmul.msk.f32.gmra.mxu0 %vm38_vm0, %v711_v7  ;;  %552 = vmatmul.msk.f32.gmra.mxu1 %vm38_vm0, %v711_v7 }
  0x33   :  { %537 = vmatmul.msk.f32.gmra.mxu0 %vm38_vm0, %v720_v8  ;;  %553 = vmatmul.msk.f32.gmra.mxu1 %vm38_vm0, %v720_v8 }
  0x3b   :  { %538 = vmatmul.msk.f32.gmra.mxu0 %vm38_vm0, %v729_v9  ;;  %554 = vmatmul.msk.f32.gmra.mxu1 %vm38_vm0, %v729_v9 }
  0x43   :  { %539 = vmatmul.msk.f32.gmra.mxu0 %vm38_vm0, %v738_v10  ;;  %555 = vmatmul.msk.f32.gmra.mxu1 %vm38_vm0, %v738_v10 }
  0x4b   :  { %540 = vmatmul.msk.f32.gmra.mxu0 %vm38_vm0, %v747_v11  ;;  %556 = vmatmul.msk.f32.gmra.mxu1 %vm38_vm0, %v747_v11 }
  0x53   :  { %541 = vmatmul.msk.f32.gmra.mxu0 %vm38_vm0, %v756_v12  ;;  %557 = vmatmul.msk.f32.gmra.mxu1 %vm38_vm0, %v756_v12 }
  0x5b   :  { %542 = vmatmul.msk.f32.gmra.mxu0 %vm38_vm0, %v765_v13  ;;  %558 = vmatmul.msk.f32.gmra.mxu1 %vm38_vm0, %v765_v13 }
  0x63   :  { %543 = vmatmul.msk.f32.gmra.mxu0 %vm38_vm0, %v774_v14  ;;  %559 = vmatmul.msk.f32.gmra.mxu1 %vm38_vm0, %v774_v14 }
  0x6b   :  { %544 = vmatmul.msk.f32.gmra.mxu0 %vm38_vm0, %v783_v15  ;;  %560 = vmatmul.msk.f32.gmra.mxu1 %vm38_vm0, %v783_v15 }
  0x73   :  { %545 = vmatmul.msk.f32.gmra.mxu0 %vm38_vm0, %v792_v16  ;;  %561 = vmatmul.msk.f32.gmra.mxu1 %vm38_vm0, %v792_v16 }
  0x7b   :  { %546 = vmatmul.msk.f32.gmra.mxu0 %vm38_vm0, %v801_v17  ;;  %562 = vmatmul.msk.f32.gmra.mxu1 %vm38_vm0, %v801_v17 }
  0x80   :  { %v807_v18 = vpop.f32.mrf.mxu0  ;;  %v809_v19 = vpop.f32.mrf.mxu1 }
  0x88   :  { %v811_v20 = vpop.f32.mrf.mxu0  ;;  %v813_v21 = vpop.f32.mrf.mxu1 }
  0x90   :  { %v815_v22 = vpop.f32.mrf.mxu0  ;;  %v817_v23 = vpop.f32.mrf.mxu1 }
  0x98   :  { %v819_v24 = vpop.f32.mrf.mxu0  ;;  %v821_v25 = vpop.f32.mrf.mxu1 }
  0xa0   :  { %v823_v26 = vpop.f32.mrf.mxu0  ;;  %v825_v27 = vpop.f32.mrf.mxu1 }
  0xa8   :  { %v827_v28 = vpop.f32.mrf.mxu0  ;;  %v829_v29 = vpop.f32.mrf.mxu1 }
  0xb0   :  { %v831_v30 = vpop.f32.mrf.mxu0  ;;  %v833_v31 = vpop.f32.mrf.mxu1 }
  0xb8   :  { %v125_v32 = vpop.f32.mrf.mxu0  ;;  %v190_v33 = vpop.f32.mrf.mxu1 }
  0xc0   :  { %v128_v34 = vpop.f32.mrf.mxu0  ;;  %v193_v35 = vpop.f32.mrf.mxu1 }
  0xc1   :  { %v233_v1 = vmax.f32 %v128_v34, 0.0  ;;  %v227_v34 = vmax.f32 %v827_v28, 0.0  ;;  %v222_v28 = vmax.f32 %v817_v23, 0.0  ;;  %v563_v23 = vld [vmem:[%s978_s0 + $0x10] sm:$0xff] }
  0xc8   :  { %v131_v36 = vpop.f32.mrf.mxu0  ;;  %v196_v37 = vpop.f32.mrf.mxu1 }
  0xc9   :  { %v235_v63 = vmax.f32 %v131_v36, 0.0  ;;  %v236_v0 = vmax.f32 %v196_v37, 0.0  ;;  %v223_v36 = vmax.f32 %v819_v24, 0.0  ;;  %v218_v24 = vmax.f32 %v809_v19, 0.0 }
  0xd0   :  { %v134_v38 = vpop.f32.mrf.mxu0  ;;  %v199_v39 = vpop.f32.mrf.mxu1 }
  0xd1   :  { %v237_v60 = vmax.f32 %v134_v38, 0.0  ;;  %v238_v61 = vmax.f32 %v199_v39, 0.0  ;;  %v35_v38 = vld [vmem:[%s981_s3] sm:$0xf]  ;;  %v229_v39 = vmax.f32 %v831_v30, 0.0  ;;  %v224_v30 = vmax.f32 %v821_v25, 0.0 }
  0xd2   :  { %251 = vperm.xlu0 %601, %v35_v38  }
  0xd8   :  { %v137_v40 = vpop.f32.mrf.mxu0  ;;  %v202_v41 = vpop.f32.mrf.mxu1 }
  0xd9   :  { %v239_v58 = vmax.f32 %v137_v40, 0.0  ;;  %v240_v59 = vmax.f32 %v202_v41, 0.0  ;;  %v230_v40 = vmax.f32 %v833_v31, 0.0  ;;  %v221_v31 = vmax.f32 %v815_v22, 0.0  ;;  %v855_v22 = vld [vmem:[%s980_s2] sm:$0xf] }
  0xe0   :  { %v140_v42 = vpop.f32.mrf.mxu0  ;;  %v205_v43 = vpop.f32.mrf.mxu1 }
  0xe1   :  { %v241_v56 = vmax.f32 %v140_v42, 0.0  ;;  %v242_v57 = vmax.f32 %v205_v43, 0.0  ;;  %v231_v42 = vmax.f32 %v125_v32, 0.0  ;;  %v232_v43 = vmax.f32 %v190_v33, 0.0 }
  0xe2   :  { %v225_v32 = vmax.f32 %v823_v26, 0.0  ;;  %v226_v33 = vmax.f32 %v825_v27, 0.0  ;;  %v220_v26 = vmax.f32 %v813_v21, 0.0  ;;  %v217_v27 = vmax.f32 %v807_v18, 0.0 }
  0xe8   :  { %v143_v44 = vpop.f32.mrf.mxu0  ;;  %v208_v45 = vpop.f32.mrf.mxu1 }
  0xe9   :  { %v243_v54 = vmax.f32 %v143_v44, 0.0  ;;  %v244_v55 = vmax.f32 %v208_v45, 0.0  ;;  %v234_v44 = vmax.f32 %v193_v35, 0.0  ;;  %v228_v35 = vmax.f32 %v829_v29, 0.0 }
  0xea   :  { %v219_v29 = vmax.f32 %v811_v20, 0.0  ;;  %v564_v20 = vld [vmem:[%s978_s0 + $0x18] sm:$0xff]  ;;  %s629_s0 = smov [#allocation2]  }
  0xeb   :  { %s517_s2 = sshll.u32 %s629_s0, 4  ;;  %s518_s2 = int_to_ptr.vmem [resolvable:$true] %s517_s2 }
  0xf0   :  { %v146_v46 = vpop.f32.mrf.mxu0  ;;  %v211_v47 = vpop.f32.mrf.mxu1 }
  0xf1   :  { %v245_v52 = vmax.f32 %v146_v46, 0.0  ;;  %v246_v53 = vmax.f32 %v211_v47, 0.0 }
  0xf8   :  { %v149_v48 = vpop.f32.mrf.mxu0  ;;  %v214_v49 = vpop.f32.mrf.mxu1 }
  0xf9   :  { %v247_v50 = vmax.f32 %v149_v48, 0.0  ;;  %v248_v51 = vmax.f32 %v214_v49, 0.0 }
  0xfb   :  { %254 = vmatpush.msra.mxu2 %v247_v50  ;;  %274 = vmatpush.msra.mxu3 %v248_v51 }
  0xfd   :  { %255 = vmatpush.msra.mxu2 %v245_v52  ;;  %275 = vmatpush.msra.mxu3 %v246_v53 }
  0xff   :  { %256 = vmatpush.msra.mxu2 %v243_v54  ;;  %276 = vmatpush.msra.mxu3 %v244_v55 }
 0x101   :  { %257 = vmatpush.msra.mxu2 %v241_v56  ;;  %277 = vmatpush.msra.mxu3 %v242_v57 }
 0x103   :  { %258 = vmatpush.msra.mxu2 %v239_v58  ;;  %278 = vmatpush.msra.mxu3 %v240_v59 }
 0x105   :  { %259 = vmatpush.msra.mxu2 %v237_v60  ;;  %279 = vmatpush.msra.mxu3 %v238_v61 }
 0x107   :  { %260 = vmatpush.msra.mxu2 %v235_v63  ;;  %280 = vmatpush.msra.mxu3 %v236_v0 }
 0x109   :  { %261 = vmatpush.msra.mxu2 %v233_v1  ;;  %281 = vmatpush.msra.mxu3 %v234_v44 }
 0x10b   :  { %262 = vmatpush.msra.mxu2 %v231_v42  ;;  %282 = vmatpush.msra.mxu3 %v232_v43 }
 0x10d   :  { %263 = vmatpush.msra.mxu2 %v229_v39  ;;  %283 = vmatpush.msra.mxu3 %v230_v40 }
 0x10f   :  { %264 = vmatpush.msra.mxu2 %v227_v34  ;;  %284 = vmatpush.msra.mxu3 %v228_v35 }
 0x111   :  { %265 = vmatpush.msra.mxu2 %v225_v32  ;;  %285 = vmatpush.msra.mxu3 %v226_v33 }
 0x113   :  { %266 = vmatpush.msra.mxu2 %v223_v36  ;;  %286 = vmatpush.msra.mxu3 %v224_v30 }
 0x115   :  { %267 = vmatpush.msra.mxu2 %v221_v31  ;;  %287 = vmatpush.msra.mxu3 %v222_v28 }
 0x117   :  { %268 = vmatpush.msra.mxu2 %v219_v29  ;;  %288 = vmatpush.msra.mxu3 %v220_v26 }
 0x119   :  { %269 = vmatpush.msra.mxu2 %v217_v27  ;;  %289 = vmatpush.msra.mxu3 %v218_v24 }
 0x11a   :  { %270 = vmatmul.f32.vlgmr.msra.gmra.mxu2 %v855_v22  ;;  %290 = vmatmul.f32.vlgmr.msra.gmra.mxu3 %v855_v22 }
 0x11b   :  { %319 = vmatpush.msrb.mxu2 %v563_v23  ;;  %384 = vmatpush.msrb.mxu3 %v564_v20 }
 0x122   :  { %565 = vmatmul.msk.f32.vlgmr.msrb.gmra.mxu2 %vm38_vm0, %v666_v2  ;;  %581 = vmatmul.msk.f32.vlgmr.msrb.gmra.mxu3 %vm38_vm0, %v666_v2 }
 0x12a   :  { %566 = vmatmul.msk.f32.gmra.mxu2 %vm38_vm0, %v675_v3  ;;  %582 = vmatmul.msk.f32.gmra.mxu3 %vm38_vm0, %v675_v3 }
 0x132   :  { %567 = vmatmul.msk.f32.gmra.mxu2 %vm38_vm0, %v684_v4  ;;  %583 = vmatmul.msk.f32.gmra.mxu3 %vm38_vm0, %v684_v4 }
 0x13a   :  { %568 = vmatmul.msk.f32.gmra.mxu2 %vm38_vm0, %v693_v5  ;;  %584 = vmatmul.msk.f32.gmra.mxu3 %vm38_vm0, %v693_v5 }
 0x142   :  { %569 = vmatmul.msk.f32.gmra.mxu2 %vm38_vm0, %v702_v6  ;;  %585 = vmatmul.msk.f32.gmra.mxu3 %vm38_vm0, %v702_v6 }
 0x144   :  { %v929_v2 = vpop.permute.xlu0 %251 }
 0x14a   :  { %570 = vmatmul.msk.f32.gmra.mxu2 %vm38_vm0, %v711_v7  ;;  %586 = vmatmul.msk.f32.gmra.mxu3 %vm38_vm0, %v711_v7 }
 0x152   :  { %571 = vmatmul.msk.f32.gmra.mxu2 %vm38_vm0, %v720_v8  ;;  %587 = vmatmul.msk.f32.gmra.mxu3 %vm38_vm0, %v720_v8 }
 0x15a   :  { %572 = vmatmul.msk.f32.gmra.mxu2 %vm38_vm0, %v729_v9  ;;  %588 = vmatmul.msk.f32.gmra.mxu3 %vm38_vm0, %v729_v9 }
 0x162   :  { %573 = vmatmul.msk.f32.gmra.mxu2 %vm38_vm0, %v738_v10  ;;  %589 = vmatmul.msk.f32.gmra.mxu3 %vm38_vm0, %v738_v10 }
 0x16a   :  { %574 = vmatmul.msk.f32.gmra.mxu2 %vm38_vm0, %v747_v11  ;;  %590 = vmatmul.msk.f32.gmra.mxu3 %vm38_vm0, %v747_v11 }
 0x172   :  { %575 = vmatmul.msk.f32.gmra.mxu2 %vm38_vm0, %v756_v12  ;;  %591 = vmatmul.msk.f32.gmra.mxu3 %vm38_vm0, %v756_v12 }
 0x17a   :  { %576 = vmatmul.msk.f32.gmra.mxu2 %vm38_vm0, %v765_v13  ;;  %592 = vmatmul.msk.f32.gmra.mxu3 %vm38_vm0, %v765_v13 }
 0x182   :  { %577 = vmatmul.msk.f32.gmra.mxu2 %vm38_vm0, %v774_v14  ;;  %593 = vmatmul.msk.f32.gmra.mxu3 %vm38_vm0, %v774_v14 }
 0x18a   :  { %578 = vmatmul.msk.f32.gmra.mxu2 %vm38_vm0, %v783_v15  ;;  %594 = vmatmul.msk.f32.gmra.mxu3 %vm38_vm0, %v783_v15 }
 0x192   :  { %579 = vmatmul.msk.f32.gmra.mxu2 %vm38_vm0, %v792_v16  ;;  %595 = vmatmul.msk.f32.gmra.mxu3 %vm38_vm0, %v792_v16 }
 0x19a   :  { %580 = vmatmul.msk.f32.gmra.mxu2 %vm38_vm0, %v801_v17  ;;  %596 = vmatmul.msk.f32.gmra.mxu3 %vm38_vm0, %v801_v17 }
 0x19d   :  { %v271_v3 = vpop.f32.mrf.mxu2  ;;  %v291_v4 = vpop.f32.mrf.mxu3 }
 0x19e   :  { %v272_v5 = vadd.f32 %v271_v3, %v929_v2  ;;  %v292_v6 = vadd.f32 %v291_v4, %v929_v2 }
 0x1a0   :  { %v296_v7 = vrot.slane %v292_v6, 4 }
 0x1a2   :  { %v298_v8 = vsel %vm297_vm1, %v272_v5, %v296_v7 }
 0x1a3   :  { %300 = vst [vmem:[#allocation2] sm:$0xff] %v298_v8 }
 0x1a5   :  { %v934_v9 = vpop.f32.mrf.mxu2  ;;  %v936_v10 = vpop.f32.mrf.mxu3 }
 0x1ad   :  { %v938_v11 = vpop.f32.mrf.mxu2  ;;  %v940_v12 = vpop.f32.mrf.mxu3 }
 0x1ae   :  { %v436_v7 = vmax.f32 %v938_v11, 0.0  ;;  %v437_v8 = vmax.f32 %v940_v12, 0.0 }
 0x1b5   :  { %v942_v13 = vpop.f32.mrf.mxu2  ;;  %v944_v14 = vpop.f32.mrf.mxu3 }
 0x1b6   :  { %v438_v5 = vmax.f32 %v942_v13, 0.0  ;;  %v439_v6 = vmax.f32 %v944_v14, 0.0 }
 0x1bd   :  { %v946_v15 = vpop.f32.mrf.mxu2  ;;  %v948_v16 = vpop.f32.mrf.mxu3 }
 0x1be   :  { %v440_v3 = vmax.f32 %v946_v15, 0.0  ;;  %v441_v4 = vmax.f32 %v948_v16, 0.0  ;;  %v435_v15 = vmax.f32 %v936_v10, 0.0 }
 0x1c5   :  { %v950_v17 = vpop.f32.mrf.mxu2  ;;  %v952_v18 = vpop.f32.mrf.mxu3 }
 0x1c6   :  { %v442_v23 = vmax.f32 %v950_v17, 0.0  ;;  %v443_v20 = vmax.f32 %v952_v18, 0.0  ;;  %v434_v17 = vmax.f32 %v934_v9, 0.0 }
 0x1cd   :  { %v954_v19 = vpop.f32.mrf.mxu2  ;;  %v956_v21 = vpop.f32.mrf.mxu3 }
 0x1ce   :  { %v444_v27 = vmax.f32 %v954_v19, 0.0  ;;  %v445_v24 = vmax.f32 %v956_v21, 0.0 }
 0x1d5   :  { %v339_v25 = vpop.f32.mrf.mxu2  ;;  %v404_v37 = vpop.f32.mrf.mxu3 }
 0x1d6   :  { %v446_v29 = vmax.f32 %v339_v25, 0.0  ;;  %v447_v26 = vmax.f32 %v404_v37, 0.0 }
 0x1dd   :  { %v342_v41 = vpop.f32.mrf.mxu2  ;;  %v407_v45 = vpop.f32.mrf.mxu3 }
 0x1de   :  { %v448_v31 = vmax.f32 %v342_v41, 0.0  ;;  %v449_v28 = vmax.f32 %v407_v45, 0.0 }
 0x1e5   :  { %v345_v46 = vpop.f32.mrf.mxu2  ;;  %v410_v47 = vpop.f32.mrf.mxu3 }
 0x1e6   :  { %v450_v36 = vmax.f32 %v345_v46, 0.0  ;;  %v451_v30 = vmax.f32 %v410_v47, 0.0 }
 0x1ed   :  { %v348_v48 = vpop.f32.mrf.mxu2  ;;  %v413_v49 = vpop.f32.mrf.mxu3 }
 0x1ee   :  { %v452_v32 = vmax.f32 %v348_v48, 0.0  ;;  %v453_v33 = vmax.f32 %v413_v49, 0.0 }
 0x1f5   :  { %v351_v50 = vpop.f32.mrf.mxu2  ;;  %v416_v51 = vpop.f32.mrf.mxu3 }
 0x1f6   :  { %v454_v34 = vmax.f32 %v351_v50, 0.0  ;;  %v455_v35 = vmax.f32 %v416_v51, 0.0 }
 0x1fd   :  { %v354_v52 = vpop.f32.mrf.mxu2  ;;  %v419_v53 = vpop.f32.mrf.mxu3 }
 0x1fe   :  { %v456_v39 = vmax.f32 %v354_v52, 0.0  ;;  %v457_v40 = vmax.f32 %v419_v53, 0.0 }
 0x205   :  { %v357_v54 = vpop.f32.mrf.mxu2  ;;  %v422_v55 = vpop.f32.mrf.mxu3 }
 0x206   :  { %v458_v43 = vmax.f32 %v357_v54, 0.0  ;;  %v459_v38 = vmax.f32 %v422_v55, 0.0 }
 0x20d   :  { %v360_v56 = vpop.f32.mrf.mxu2  ;;  %v425_v57 = vpop.f32.mrf.mxu3 }
 0x20e   :  { %v460_v44 = vmax.f32 %v360_v56, 0.0  ;;  %v461_v42 = vmax.f32 %v425_v57, 0.0 }
 0x215   :  { %v363_v58 = vpop.f32.mrf.mxu2  ;;  %v428_v59 = vpop.f32.mrf.mxu3 }
 0x216   :  { %v462_v0 = vmax.f32 %v363_v58, 0.0  ;;  %v463_v1 = vmax.f32 %v428_v59, 0.0 }
 0x21d   :  { %v366_v60 = vpop.f32.mrf.mxu2  ;;  %v431_v61 = vpop.f32.mrf.mxu3 }
 0x21e   :  { %v464_v62 = vmax.f32 %v366_v60, 0.0  ;;  %v465_v63 = vmax.f32 %v431_v61, 0.0 }
 0x220   :  { %466 = vmatpush.msrb.mxu0 %v464_v62  ;;  %486 = vmatpush.msrb.mxu1 %v465_v63 }
 0x222   :  { %467 = vmatpush.msrb.mxu0 %v462_v0  ;;  %487 = vmatpush.msrb.mxu1 %v463_v1 }
 0x224   :  { %468 = vmatpush.msrb.mxu0 %v460_v44  ;;  %488 = vmatpush.msrb.mxu1 %v461_v42 }
 0x226   :  { %469 = vmatpush.msrb.mxu0 %v458_v43  ;;  %489 = vmatpush.msrb.mxu1 %v459_v38 }
 0x228   :  { %470 = vmatpush.msrb.mxu0 %v456_v39  ;;  %490 = vmatpush.msrb.mxu1 %v457_v40 }
 0x22a   :  { %471 = vmatpush.msrb.mxu0 %v454_v34  ;;  %491 = vmatpush.msrb.mxu1 %v455_v35 }
 0x22c   :  { %472 = vmatpush.msrb.mxu0 %v452_v32  ;;  %492 = vmatpush.msrb.mxu1 %v453_v33 }
 0x22e   :  { %473 = vmatpush.msrb.mxu0 %v450_v36  ;;  %493 = vmatpush.msrb.mxu1 %v451_v30 }
 0x230   :  { %474 = vmatpush.msrb.mxu0 %v448_v31  ;;  %494 = vmatpush.msrb.mxu1 %v449_v28 }
 0x232   :  { %475 = vmatpush.msrb.mxu0 %v446_v29  ;;  %495 = vmatpush.msrb.mxu1 %v447_v26 }
 0x234   :  { %476 = vmatpush.msrb.mxu0 %v444_v27  ;;  %496 = vmatpush.msrb.mxu1 %v445_v24 }
 0x236   :  { %477 = vmatpush.msrb.mxu0 %v442_v23  ;;  %497 = vmatpush.msrb.mxu1 %v443_v20 }
 0x238   :  { %478 = vmatpush.msrb.mxu0 %v440_v3  ;;  %498 = vmatpush.msrb.mxu1 %v441_v4 }
 0x23a   :  { %479 = vmatpush.msrb.mxu0 %v438_v5  ;;  %499 = vmatpush.msrb.mxu1 %v439_v6 }
 0x23c   :  { %480 = vmatpush.msrb.mxu0 %v436_v7  ;;  %500 = vmatpush.msrb.mxu1 %v437_v8 }
 0x23e   :  { %481 = vmatpush.msrb.mxu0 %v434_v17  ;;  %501 = vmatpush.msrb.mxu1 %v435_v15 }
 0x23f   :  { %502 = vmatmul.f32.vlgmr.msrb.gmra.mxu1 %v855_v22  ;;  %482 = vmatmul.f32.vlgmr.msrb.gmra.mxu0 %v855_v22 }
 0x2bc   :  { %v503_v13 = vpop.f32.mrf.mxu1  ;;  %v483_v14 = vpop.f32.mrf.mxu0 }
 0x2bd   :  { %v504_v9 = vadd.f32 %v503_v13, %v929_v2  ;;  %v484_v10 = vadd.f32 %v483_v14, %v929_v2 }
 0x2bf   :  { %v508_v11 = vrot.slane %v504_v9, 4 }
 0x2c1   :  { %v509_v12 = vsel %vm297_vm1, %v484_v10, %v508_v11 }
 0x2c2   :  { %512 = vst [vmem:[#allocation2 + $0x8] sm:$0xff] %v509_v12 }
 0x2c3   :  { %525 = dma.vmem_to_hbm [thread:$0]  %s518_s2, 256, %s520_s7, [#allocation3], %s630_s8, %s630_s8, %s631_s9  }
 0x2c4   :  { %626 = dma.done.wait [#allocation3], 256  }
 0x2c5   :  { %627 = vsyncadd [#allocation3], 4294967040 }
 0x2c6   :  { %530 = vsyncpa [#allocation3], 1 }

</bundles_post_ra>
